<compile_context>
chip_gen: v6e
topology: v6e:2x2x1
jax: 0.10.0
libtpu: 0.0.40
codegen_flags: <defaults>
</compile_context>

<pallas_src>
import functools

import jax
import jax.numpy as jnp
from jax.experimental import pallas as pl
from jax.experimental.pallas import tpu as pltpu


# --------------------------------------------------------------------- fused kernel
def _vae_fused_kernel(x_ref, eps_ref,
                      g2wa_ref, g2wg_ref, g2ba_ref, g2bg_ref,
                      w11_ref, b11_ref, w12_ref, b12_ref,
                      w2_ref, b2_ref,
                      g3wa_ref, g3wg_ref, g3ba_ref, g3bg_ref,
                      w3_ref, b3_ref,
                      logp_ref, mu_ref, lv_ref,
                      *, residual):
    f32 = jnp.float32
    B, S, E = x_ref.shape

    # -------- encoder GCNN2: 3-tap conv (taps stacked along K) + GLU, batch in M
    x = x_ref[...]                                              # (B, S, E)
    zrow = jnp.zeros((B, 1, E), f32)                            # in-kernel seq padding
    x_prev = jnp.concatenate([zrow, x[:, :S - 1, :]], axis=1)   # x[s-1]
    x_next = jnp.concatenate([x[:, 1:, :], zrow], axis=1)       # x[s+1]
    x3 = jnp.concatenate([x_prev, x, x_next], axis=-1)          # (B, S, 3E)
    x3 = x3.reshape(B * S, 3 * E)
    a = jnp.dot(x3, g2wa_ref[...], preferred_element_type=f32) + g2ba_ref[...]
    g = jnp.dot(x3, g2wg_ref[...], preferred_element_type=f32) + g2bg_ref[...]
    h_rows = a * jax.nn.sigmoid(g)                              # (B*S, E)
    if residual:
        h_rows = x.reshape(B * S, E) + h_rows

    # -------- mean over seq + fc11 / fc12
    m = jnp.mean(h_rows.reshape(B, S, E), axis=1)               # (B, E)
    mu = jnp.dot(m, w11_ref[...], preferred_element_type=f32) + b11_ref[...]
    lv = jnp.dot(m, w12_ref[...], preferred_element_type=f32) + b12_ref[...]
    mu_ref[...] = mu
    lv_ref[...] = lv

    # -------- reparameterize + fc2 (weight pre-blocked to (S, H, E))
    z = mu + eps_ref[...] * jnp.exp(0.5 * lv)                   # (B, H)
    H = z.shape[-1]
    z_b = jnp.broadcast_to(z[None], (S, B, H))                  # (S, B, H)
    h2 = jnp.einsum("sbh,she->sbe", z_b, w2_ref[...],
                    preferred_element_type=f32) + b2_ref[...]   # (S, B, E)

    # -------- decoder GCNN3 in (S, B, E) layout (seq axis leading)
    zrow2 = jnp.zeros((1, B, E), f32)
    h2_prev = jnp.concatenate([zrow2, h2[:S - 1]], axis=0)
    h2_next = jnp.concatenate([h2[1:], zrow2], axis=0)
    h23 = jnp.concatenate([h2_prev, h2, h2_next], axis=-1)      # (S, B, 3E)
    h23 = h23.reshape(S * B, 3 * E)
    a3 = jnp.dot(h23, g3wa_ref[...], preferred_element_type=f32) + g3ba_ref[...]
    g3 = jnp.dot(h23, g3wg_ref[...], preferred_element_type=f32) + g3bg_ref[...]
    h3 = a3 * jax.nn.sigmoid(g3)                                # (S*B, E)
    if residual:
        h3 = h2.reshape(S * B, E) + h3

    # -------- fc3 + log_softmax (vocab padded to lane-dense multiple of 128;
    # padded bias columns are -1e30, so they contribute 0 to the normalization)
    logits = jnp.dot(h3, w3_ref[...], preferred_element_type=f32) + b3_ref[...]
    mx = jnp.max(logits, axis=-1, keepdims=True)
    sh = logits - mx
    lse = jnp.log(jnp.sum(jnp.exp(sh), axis=-1, keepdims=True))
    logp_ref[...] = (sh - lse).astype(logp_ref.dtype)           # (S*B, Vp)


# ------------------------------------------------------------------- param re-layout
def _prep_gcnn_params(w_taps, conv_b, b_param, batch, row_order):
    """Fold taps along K, split GLU halves, fold conv bias + b into one bias.

    w_taps: (3, E, 2E)  tap kh maps x[s+kh-1] -> 2E channels
    conv_b: (1, 2E), b_param: (S, 2E)
    row_order: 'bs' (rows = b*S+s) or 'sb' (rows = s*B+b) for bias expansion.
    """
    E = w_taps.shape[1]
    w_cat = jnp.concatenate([w_taps[0], w_taps[1], w_taps[2]], axis=0)  # (3E, 2E)
    bias = conv_b + b_param                                             # (S, 2E)
    wa, wg = w_cat[:, :E], w_cat[:, E:]
    ba, bg = bias[:, :E], bias[:, E:]
    if row_order == "bs":
        ba = jnp.tile(ba, (batch, 1))       # (B*S, E), bias[s] at row b*S+s
        bg = jnp.tile(bg, (batch, 1))
    else:
        ba = jnp.repeat(ba, batch, axis=0)  # (S*B, E), bias[s] at row s*B+b
        bg = jnp.repeat(bg, batch, axis=0)
    return wa, wg, ba, bg


# ----------------------------------------------------------------------- VAE forward
def vae_forward(params, tokens, eps, *, residual=False):
    B, S = tokens.shape
    E = params["emb"].shape[1]
    H = params["fc11_w"].shape[1]
    V = params["fc3_w"].shape[1]
    Vp = int(pl.cdiv(V, 128)) * 128

    # TODO(synk): embedding gather stays in XLA glue (per-token dynamic gather
    # has no useful Pallas tile mapping at these sizes).
    x = jnp.take(params["emb"], tokens, axis=0)                 # (B, S, E)

    # NOTE: PyTorch encode() computes gcnn1(emb) and immediately discards it;
    # only gcnn2(emb) reaches the output, so gcnn1 is skipped here.
    g2wa, g2wg, g2ba, g2bg = _prep_gcnn_params(
        params["g2_w"], params["g2_cb"], params["g2_b"], B, "bs")
    g3wa, g3wg, g3ba, g3bg = _prep_gcnn_params(
        params["g3_w"], params["g3_cb"], params["g3_b"], B, "sb")

    w2_blk = params["fc2_w"].reshape(H, S, E).transpose(1, 0, 2)        # (S, H, E)
    b2_full = jnp.broadcast_to(
        params["fc2_b"].reshape(S, E)[:, None, :], (S, B, E))           # (S, B, E)

    w3p = jnp.pad(params["fc3_w"], ((0, 0), (0, Vp - V)))               # (E, Vp)
    if Vp > V:
        b3p = jnp.concatenate(
            [params["fc3_b"], jnp.full((1, Vp - V), -1e30, jnp.float32)], axis=1)
    else:
        b3p = params["fc3_b"]

    def fs(*shape):   # full-array block, single grid step
        return pl.BlockSpec(shape, lambda i, _z=(0,) * len(shape): _z)

    kernel = functools.partial(_vae_fused_kernel, residual=residual)

    logp_rows, mu, lv = pl.pallas_call(
        kernel,
        out_shape=(jax.ShapeDtypeStruct((S * B, Vp), jnp.float32),
                   jax.ShapeDtypeStruct((B, H), jnp.float32),
                   jax.ShapeDtypeStruct((B, H), jnp.float32)),
        grid=(1,),
        in_specs=[
            fs(B, S, E), fs(B, H),
            fs(3 * E, E), fs(3 * E, E), fs(B * S, E), fs(B * S, E),
            fs(E, H), fs(1, H), fs(E, H), fs(1, H),
            fs(S, H, E), fs(S, B, E),
            fs(3 * E, E), fs(3 * E, E), fs(S * B, E), fs(S * B, E),
            fs(E, Vp), fs(1, Vp),
        ],
        out_specs=(fs(S * B, Vp), fs(B, H), fs(B, H)),
        compiler_params=pltpu.CompilerParams(dimension_semantics=("arbitrary",)),
    )(x, eps,
      g2wa, g2wg, g2ba, g2bg,
      params["fc11_w"], params["fc11_b"], params["fc12_w"], params["fc12_b"],
      w2_blk, b2_full,
      g3wa, g3wg, g3ba, g3bg,
      w3p, b3p)

    # glue: rows are ordered s*B+b -> (B, S, V)
    logp = logp_rows.reshape(S, B, Vp).transpose(1, 0, 2)[:, :, :V]
    return logp, mu, lv


# ----------------------------------------------------------------------- pure-JAX ref
def _gcnn_ref(x, w_taps, cb, bp):
    S, E = x.shape[1], x.shape[2]
    y0 = jnp.einsum("bse,ec->bsc", x, w_taps[0])
    y1 = jnp.einsum("bse,ec->bsc", x, w_taps[1])
    y2 = jnp.einsum("bse,ec->bsc", x, w_taps[2])
    h = (y1
         + jnp.pad(y0, ((0, 0), (1, 0), (0, 0)))[:, :S]
         + jnp.pad(y2, ((0, 0), (0, 1), (0, 0)))[:, 1:])
    h = h + cb[None] + bp[None]
    return h[..., :E] * jax.nn.sigmoid(h[..., E:])


def vae_ref(params, tokens, eps):
    S = params["g3_b"].shape[0]
    E = params["fc3_w"].shape[0]
    emb = jnp.take(params["emb"], tokens, axis=0)
    h = _gcnn_ref(emb, params["g2_w"], params["g2_cb"], params["g2_b"])
    m = h.mean(axis=1)
    mu = m @ params["fc11_w"] + params["fc11_b"]
    logvar = m @ params["fc12_w"] + params["fc12_b"]
    z = mu + eps * jnp.exp(0.5 * logvar)
    h2 = (z @ params["fc2_w"] + params["fc2_b"]).reshape(-1, S, E)
    h3 = _gcnn_ref(h2, params["g3_w"], params["g3_cb"], params["g3_b"])
    logits = h3 @ params["fc3_w"] + params["fc3_b"][None]
    return jax.nn.log_softmax(logits, axis=-1), mu, logvar


# ------------------------------------------------------------------------ params init
def init_params(key, seq_len, vocab_size, emb_dim, hidden_dim):
    ks = jax.random.split(key, 16)

    def nrm(k, shape, scale=0.1):
        return scale * jax.random.normal(k, shape, dtype=jnp.float32)

    # Conv2d weight (2E, 1, 3, E) re-laid-out as 3 taps of shape (E, 2E):
    # tap kh maps x[s + kh - 1] -> 2E channels.
    return dict(
        emb=nrm(ks[0], (vocab_size, emb_dim)),
        g2_w=nrm(ks[1], (3, emb_dim, 2 * emb_dim)),
        g2_cb=nrm(ks[2], (1, 2 * emb_dim)),
        g2_b=nrm(ks[3], (seq_len, 2 * emb_dim)),
        g3_w=nrm(ks[4], (3, emb_dim, 2 * emb_dim)),
        g3_cb=nrm(ks[5], (1, 2 * emb_dim)),
        g3_b=nrm(ks[6], (seq_len, 2 * emb_dim)),
        fc11_w=nrm(ks[7], (emb_dim, hidden_dim)),
        fc11_b=nrm(ks[8], (1, hidden_dim)),
        fc12_w=nrm(ks[9], (emb_dim, hidden_dim)),
        fc12_b=nrm(ks[10], (1, hidden_dim)),
        fc2_w=nrm(ks[11], (hidden_dim, seq_len * emb_dim)),
        fc2_b=nrm(ks[12], (1, seq_len * emb_dim)),
        fc3_w=nrm(ks[13], (emb_dim, vocab_size)),
        fc3_b=nrm(ks[14], (1, vocab_size)),
    )


if __name__ == "__main__":
    BATCH, SEQ_LEN, VOCAB, EMB_DIM, HIDDEN = 2, 8, 64, 32, 32

    key = jax.random.PRNGKey(0)
    kp, kt, ke = jax.random.split(key, 3)
    params = init_params(kp, SEQ_LEN, VOCAB, EMB_DIM, HIDDEN)
    tokens = jax.random.randint(kt, (BATCH, SEQ_LEN), 0, VOCAB, dtype=jnp.int32)
    # torch.normal(...).cuda() in reparameterize() is non-deterministic; we pass
    # a deterministic eps drawn from PRNGKey(0) instead.
    eps = jax.random.normal(ke, (BATCH, HIDDEN), dtype=jnp.float32)

    logp, mu, logvar = jax.jit(vae_forward)(params, tokens, eps)
    jax.block_until_ready((logp, mu, logvar))

    logp_r, mu_r, lv_r = vae_ref(params, tokens, eps)
    assert logp.shape == (BATCH, SEQ_LEN, VOCAB)
    assert mu.shape == (BATCH, HIDDEN) and logvar.shape == (BATCH, HIDDEN)
    assert jnp.allclose(mu, mu_r, rtol=1e-2, atol=1e-2)
    assert jnp.allclose(logvar, lv_r, rtol=1e-2, atol=1e-2)
    assert jnp.allclose(logp, logp_r, rtol=1e-2, atol=1e-2)

    print("KERNEL_OK")
</pallas_src>

<mosaic_0001>
module attributes {stable_mosaic.version = 11 : i64} {
  func.func @_vae_fused_kernel(%arg0: i32, %arg1: memref<2x8x32xf32, #tpu.memory_space<vmem>>, %arg2: memref<2x32xf32, #tpu.memory_space<vmem>>, %arg3: memref<96x32xf32, #tpu.memory_space<vmem>>, %arg4: memref<96x32xf32, #tpu.memory_space<vmem>>, %arg5: memref<16x32xf32, #tpu.memory_space<vmem>>, %arg6: memref<16x32xf32, #tpu.memory_space<vmem>>, %arg7: memref<32x32xf32, #tpu.memory_space<vmem>>, %arg8: memref<1x32xf32, #tpu.memory_space<vmem>>, %arg9: memref<32x32xf32, #tpu.memory_space<vmem>>, %arg10: memref<1x32xf32, #tpu.memory_space<vmem>>, %arg11: memref<8x32x32xf32, #tpu.memory_space<vmem>>, %arg12: memref<8x2x32xf32, #tpu.memory_space<vmem>>, %arg13: memref<96x32xf32, #tpu.memory_space<vmem>>, %arg14: memref<96x32xf32, #tpu.memory_space<vmem>>, %arg15: memref<16x32xf32, #tpu.memory_space<vmem>>, %arg16: memref<16x32xf32, #tpu.memory_space<vmem>>, %arg17: memref<32x128xf32, #tpu.memory_space<vmem>>, %arg18: memref<1x128xf32, #tpu.memory_space<vmem>>, %arg19: memref<16x128xf32, #tpu.memory_space<vmem>>, %arg20: memref<2x32xf32, #tpu.memory_space<vmem>>, %arg21: memref<2x32xf32, #tpu.memory_space<vmem>>) attributes {dimension_semantics = [#tpu.dimension_semantics<arbitrary>], iteration_bounds = array<i64: 1>, scalar_prefetch = 0 : i64, scratch_operands = 0 : i64, tpu.core_type = #tpu.core_type<tc>, window_params = [{pipeline_mode = #tpu.pipeline_mode<synchronous>, transform_indices = @transform_0, window_bounds = array<i64: 2, 8, 32>}, {pipeline_mode = #tpu.pipeline_mode<synchronous>, transform_indices = @transform_1, window_bounds = array<i64: 2, 32>}, {pipeline_mode = #tpu.pipeline_mode<synchronous>, transform_indices = @transform_2, window_bounds = array<i64: 96, 32>}, {pipeline_mode = #tpu.pipeline_mode<synchronous>, transform_indices = @transform_3, window_bounds = array<i64: 96, 32>}, {pipeline_mode = #tpu.pipeline_mode<synchronous>, transform_indices = @transform_4, window_bounds = array<i64: 16, 32>}, {pipeline_mode = #tpu.pipeline_mode<synchronous>, transform_indices = @transform_5, window_bounds = array<i64: 16, 32>}, {pipeline_mode = #tpu.pipeline_mode<synchronous>, transform_indices = @transform_6, window_bounds = array<i64: 32, 32>}, {pipeline_mode = #tpu.pipeline_mode<synchronous>, transform_indices = @transform_7, window_bounds = array<i64: 1, 32>}, {pipeline_mode = #tpu.pipeline_mode<synchronous>, transform_indices = @transform_8, window_bounds = array<i64: 32, 32>}, {pipeline_mode = #tpu.pipeline_mode<synchronous>, transform_indices = @transform_9, window_bounds = array<i64: 1, 32>}, {pipeline_mode = #tpu.pipeline_mode<synchronous>, transform_indices = @transform_10, window_bounds = array<i64: 8, 32, 32>}, {pipeline_mode = #tpu.pipeline_mode<synchronous>, transform_indices = @transform_11, window_bounds = array<i64: 8, 2, 32>}, {pipeline_mode = #tpu.pipeline_mode<synchronous>, transform_indices = @transform_12, window_bounds = array<i64: 96, 32>}, {pipeline_mode = #tpu.pipeline_mode<synchronous>, transform_indices = @transform_13, window_bounds = array<i64: 96, 32>}, {pipeline_mode = #tpu.pipeline_mode<synchronous>, transform_indices = @transform_14, window_bounds = array<i64: 16, 32>}, {pipeline_mode = #tpu.pipeline_mode<synchronous>, transform_indices = @transform_15, window_bounds = array<i64: 16, 32>}, {pipeline_mode = #tpu.pipeline_mode<synchronous>, transform_indices = @transform_16, window_bounds = array<i64: 32, 128>}, {pipeline_mode = #tpu.pipeline_mode<synchronous>, transform_indices = @transform_17, window_bounds = array<i64: 1, 128>}, {pipeline_mode = #tpu.pipeline_mode<synchronous>, transform_indices = @transform_18, window_bounds = array<i64: 16, 128>}, {pipeline_mode = #tpu.pipeline_mode<synchronous>, transform_indices = @transform_19, window_bounds = array<i64: 2, 32>}, {pipeline_mode = #tpu.pipeline_mode<synchronous>, transform_indices = @transform_20, window_bounds = array<i64: 2, 32>}]} {
    %c0 = arith.constant 0 : index
    %c0_0 = arith.constant 0 : index
    %c0_1 = arith.constant 0 : index
    %0 = vector.load %arg1[%c0, %c0_0, %c0_1] : memref<2x8x32xf32, #tpu.memory_space<vmem>>, vector<2x8x32xf32>
    %cst = arith.constant 0.000000e+00 : f32
    %1 = vector.broadcast %cst : f32 to vector<2x1x32xf32>
    %2 = vector.extract_strided_slice %0 {offsets = [0, 0, 0], sizes = [2, 7, 32], strides = [1, 1, 1]} : vector<2x8x32xf32> to vector<2x7x32xf32>
    %3 = tpu.concatenate %1, %2 in 1 : vector<2x1x32xf32>, vector<2x7x32xf32> -> vector<2x8x32xf32>
    %4 = vector.extract_strided_slice %0 {offsets = [0, 1, 0], sizes = [2, 7, 32], strides = [1, 1, 1]} : vector<2x8x32xf32> to vector<2x7x32xf32>
    %5 = tpu.concatenate %4, %1 in 1 : vector<2x7x32xf32>, vector<2x1x32xf32> -> vector<2x8x32xf32>
    %6 = tpu.concatenate %3, %0, %5 in 2 : vector<2x8x32xf32>, vector<2x8x32xf32>, vector<2x8x32xf32> -> vector<2x8x96xf32>
    %7 = vector.shape_cast %6 : vector<2x8x96xf32> to vector<16x96xf32>
    %c0_2 = arith.constant 0 : index
    %c0_3 = arith.constant 0 : index
    %8 = vector.load %arg3[%c0_2, %c0_3] : memref<96x32xf32, #tpu.memory_space<vmem>>, vector<96x32xf32>
    %cst_4 = arith.constant dense<0.000000e+00> : vector<16x32xf32>
    %9 = tpu.matmul %7, %8, %cst_4 {dimension_numbers = #tpu.dot_dimension_numbers<[1], [0], [0], [1], [0, 0, 1, 1], [], []>} : vector<16x96xf32>, vector<96x32xf32>, vector<16x32xf32> -> vector<16x32xf32>
    %c0_5 = arith.constant 0 : index
    %c0_6 = arith.constant 0 : index
    %10 = vector.load %arg5[%c0_5, %c0_6] : memref<16x32xf32, #tpu.memory_space<vmem>>, vector<16x32xf32>
    %11 = arith.addf %9, %10 : vector<16x32xf32>
    %c0_7 = arith.constant 0 : index
    %c0_8 = arith.constant 0 : index
    %12 = vector.load %arg4[%c0_7, %c0_8] : memref<96x32xf32, #tpu.memory_space<vmem>>, vector<96x32xf32>
    %cst_9 = arith.constant dense<0.000000e+00> : vector<16x32xf32>
    %13 = tpu.matmul %7, %12, %cst_9 {dimension_numbers = #tpu.dot_dimension_numbers<[1], [0], [0], [1], [0, 0, 1, 1], [], []>} : vector<16x96xf32>, vector<96x32xf32>, vector<16x32xf32> -> vector<16x32xf32>
    %c0_10 = arith.constant 0 : index
    %c0_11 = arith.constant 0 : index
    %14 = vector.load %arg6[%c0_10, %c0_11] : memref<16x32xf32, #tpu.memory_space<vmem>>, vector<16x32xf32>
    %15 = arith.addf %13, %14 : vector<16x32xf32>
    %16 = arith.negf %15 : vector<16x32xf32>
    %17 = math.exp %16 : vector<16x32xf32>
    %cst_12 = arith.constant 1.000000e+00 : f32
    %18 = vector.broadcast %cst_12 : f32 to vector<16x32xf32>
    %19 = arith.addf %18, %17 : vector<16x32xf32>
    %20 = arith.divf %18, %19 : vector<16x32xf32>
    %21 = arith.mulf %11, %20 : vector<16x32xf32>
    %22 = vector.shape_cast %21 : vector<16x32xf32> to vector<2x8x32xf32>
    %cst_13 = arith.constant dense<0.000000e+00> : vector<2x32xf32>
    %23 = vector.multi_reduction <add>, %22, %cst_13 [1] : vector<2x8x32xf32> to vector<2x32xf32>
    %cst_14 = arith.constant 8.000000e+00 : f32
    %24 = vector.broadcast %cst_14 : f32 to vector<2x32xf32>
    %25 = arith.divf %23, %24 : vector<2x32xf32>
    %c0_15 = arith.constant 0 : index
    %c0_16 = arith.constant 0 : index
    %26 = vector.load %arg7[%c0_15, %c0_16] : memref<32x32xf32, #tpu.memory_space<vmem>>, vector<32x32xf32>
    %cst_17 = arith.constant dense<0.000000e+00> : vector<2x32xf32>
    %27 = tpu.matmul %25, %26, %cst_17 {dimension_numbers = #tpu.dot_dimension_numbers<[1], [0], [0], [1], [0, 0, 1, 1], [], []>} : vector<2x32xf32>, vector<32x32xf32>, vector<2x32xf32> -> vector<2x32xf32>
    %c0_18 = arith.constant 0 : index
    %c0_19 = arith.constant 0 : index
    %28 = vector.load %arg8[%c0_18, %c0_19] : memref<1x32xf32, #tpu.memory_space<vmem>>, vector<1x32xf32>
    %29 = vector.broadcast %28 : vector<1x32xf32> to vector<2x32xf32>
    %30 = arith.addf %27, %29 : vector<2x32xf32>
    %c0_20 = arith.constant 0 : index
    %c0_21 = arith.constant 0 : index
    %31 = vector.load %arg9[%c0_20, %c0_21] : memref<32x32xf32, #tpu.memory_space<vmem>>, vector<32x32xf32>
    %cst_22 = arith.constant dense<0.000000e+00> : vector<2x32xf32>
    %32 = tpu.matmul %25, %31, %cst_22 {dimension_numbers = #tpu.dot_dimension_numbers<[1], [0], [0], [1], [0, 0, 1, 1], [], []>} : vector<2x32xf32>, vector<32x32xf32>, vector<2x32xf32> -> vector<2x32xf32>
    %c0_23 = arith.constant 0 : index
    %c0_24 = arith.constant 0 : index
    %33 = vector.load %arg10[%c0_23, %c0_24] : memref<1x32xf32, #tpu.memory_space<vmem>>, vector<1x32xf32>
    %34 = vector.broadcast %33 : vector<1x32xf32> to vector<2x32xf32>
    %35 = arith.addf %32, %34 : vector<2x32xf32>
    %c0_25 = arith.constant 0 : index
    %c0_26 = arith.constant 0 : index
    %36 = vector.load %arg20[%c0_25, %c0_26] : memref<2x32xf32, #tpu.memory_space<vmem>>, vector<2x32xf32>
    tpu.vector_store %arg20[%c0_25, %c0_26], %30 {strides = array<i32>} : memref<2x32xf32, #tpu.memory_space<vmem>>, vector<2x32xf32>,
    %c0_27 = arith.constant 0 : index
    %c0_28 = arith.constant 0 : index
    %37 = vector.load %arg21[%c0_27, %c0_28] : memref<2x32xf32, #tpu.memory_space<vmem>>, vector<2x32xf32>
    tpu.vector_store %arg21[%c0_27, %c0_28], %35 {strides = array<i32>} : memref<2x32xf32, #tpu.memory_space<vmem>>, vector<2x32xf32>,
    %c0_29 = arith.constant 0 : index
    %c0_30 = arith.constant 0 : index
    %38 = vector.load %arg2[%c0_29, %c0_30] : memref<2x32xf32, #tpu.memory_space<vmem>>, vector<2x32xf32>
    %cst_31 = arith.constant 5.000000e-01 : f32
    %39 = vector.broadcast %cst_31 : f32 to vector<2x32xf32>
    %40 = arith.mulf %39, %35 : vector<2x32xf32>
    %41 = math.exp %40 : vector<2x32xf32>
    %42 = arith.mulf %38, %41 : vector<2x32xf32>
    %43 = arith.addf %30, %42 : vector<2x32xf32>
    %44 = vector.shape_cast %43 : vector<2x32xf32> to vector<1x2x32xf32>
    %45 = vector.shape_cast %44 : vector<1x2x32xf32> to vector<1x2x32xf32>
    %46 = vector.broadcast %45 : vector<1x2x32xf32> to vector<8x2x32xf32>
    %c0_32 = arith.constant 0 : index
    %c0_33 = arith.constant 0 : index
    %c0_34 = arith.constant 0 : index
    %47 = vector.load %arg11[%c0_32, %c0_33, %c0_34] : memref<8x32x32xf32, #tpu.memory_space<vmem>>, vector<8x32x32xf32>
    "tpu.trace_start"() <{level = 10 : i32, message = "sbh,she->sbe"}> : () -> ()
    %cst_35 = arith.constant dense<0.000000e+00> : vector<8x2x32xf32>
    %48 = tpu.matmul %46, %47, %cst_35 {dimension_numbers = #tpu.dot_dimension_numbers<[2], [1], [1], [2], [0, 0, 0, 1, 1, 2], [0], [0]>} : vector<8x2x32xf32>, vector<8x32x32xf32>, vector<8x2x32xf32> -> vector<8x2x32xf32>
    "tpu.trace_stop"() : () -> ()
    %c0_36 = arith.constant 0 : index
    %c0_37 = arith.constant 0 : index
    %c0_38 = arith.constant 0 : index
    %49 = vector.load %arg12[%c0_36, %c0_37, %c0_38] : memref<8x2x32xf32, #tpu.memory_space<vmem>>, vector<8x2x32xf32>
    %50 = arith.addf %48, %49 : vector<8x2x32xf32>
    %cst_39 = arith.constant 0.000000e+00 : f32
    %51 = vector.broadcast %cst_39 : f32 to vector<1x2x32xf32>
    %52 = vector.extract_strided_slice %50 {offsets = [0, 0, 0], sizes = [7, 2, 32], strides = [1, 1, 1]} : vector<8x2x32xf32> to vector<7x2x32xf32>
    %53 = tpu.concatenate %51, %52 in 0 : vector<1x2x32xf32>, vector<7x2x32xf32> -> vector<8x2x32xf32>
    %54 = vector.extract_strided_slice %50 {offsets = [1, 0, 0], sizes = [7, 2, 32], strides = [1, 1, 1]} : vector<8x2x32xf32> to vector<7x2x32xf32>
    %55 = tpu.concatenate %54, %51 in 0 : vector<7x2x32xf32>, vector<1x2x32xf32> -> vector<8x2x32xf32>
    %56 = tpu.concatenate %53, %50, %55 in 2 : vector<8x2x32xf32>, vector<8x2x32xf32>, vector<8x2x32xf32> -> vector<8x2x96xf32>
    %57 = vector.shape_cast %56 : vector<8x2x96xf32> to vector<16x96xf32>
    %c0_40 = arith.constant 0 : index
    %c0_41 = arith.constant 0 : index
    %58 = vector.load %arg13[%c0_40, %c0_41] : memref<96x32xf32, #tpu.memory_space<vmem>>, vector<96x32xf32>
    %cst_42 = arith.constant dense<0.000000e+00> : vector<16x32xf32>
    %59 = tpu.matmul %57, %58, %cst_42 {dimension_numbers = #tpu.dot_dimension_numbers<[1], [0], [0], [1], [0, 0, 1, 1], [], []>} : vector<16x96xf32>, vector<96x32xf32>, vector<16x32xf32> -> vector<16x32xf32>
    %c0_43 = arith.constant 0 : index
    %c0_44 = arith.constant 0 : index
    %60 = vector.load %arg15[%c0_43, %c0_44] : memref<16x32xf32, #tpu.memory_space<vmem>>, vector<16x32xf32>
    %61 = arith.addf %59, %60 : vector<16x32xf32>
    %c0_45 = arith.constant 0 : index
    %c0_46 = arith.constant 0 : index
    %62 = vector.load %arg14[%c0_45, %c0_46] : memref<96x32xf32, #tpu.memory_space<vmem>>, vector<96x32xf32>
    %cst_47 = arith.constant dense<0.000000e+00> : vector<16x32xf32>
    %63 = tpu.matmul %57, %62, %cst_47 {dimension_numbers = #tpu.dot_dimension_numbers<[1], [0], [0], [1], [0, 0, 1, 1], [], []>} : vector<16x96xf32>, vector<96x32xf32>, vector<16x32xf32> -> vector<16x32xf32>
    %c0_48 = arith.constant 0 : index
    %c0_49 = arith.constant 0 : index
    %64 = vector.load %arg16[%c0_48, %c0_49] : memref<16x32xf32, #tpu.memory_space<vmem>>, vector<16x32xf32>
    %65 = arith.addf %63, %64 : vector<16x32xf32>
    %66 = arith.negf %65 : vector<16x32xf32>
    %67 = math.exp %66 : vector<16x32xf32>
    %cst_50 = arith.constant 1.000000e+00 : f32
    %68 = vector.broadcast %cst_50 : f32 to vector<16x32xf32>
    %69 = arith.addf %68, %67 : vector<16x32xf32>
    %70 = arith.divf %68, %69 : vector<16x32xf32>
    %71 = arith.mulf %61, %70 : vector<16x32xf32>
    %c0_51 = arith.constant 0 : index
    %c0_52 = arith.constant 0 : index
    %72 = vector.load %arg17[%c0_51, %c0_52] : memref<32x128xf32, #tpu.memory_space<vmem>>, vector<32x128xf32>
    %cst_53 = arith.constant dense<0.000000e+00> : vector<16x128xf32>
    %73 = tpu.matmul %71, %72, %cst_53 {dimension_numbers = #tpu.dot_dimension_numbers<[1], [0], [0], [1], [0, 0, 1, 1], [], []>} : vector<16x32xf32>, vector<32x128xf32>, vector<16x128xf32> -> vector<16x128xf32>
    %c0_54 = arith.constant 0 : index
    %c0_55 = arith.constant 0 : index
    %74 = vector.load %arg18[%c0_54, %c0_55] : memref<1x128xf32, #tpu.memory_space<vmem>>, vector<1x128xf32>
    %75 = vector.broadcast %74 : vector<1x128xf32> to vector<16x128xf32>
    %76 = arith.addf %73, %75 : vector<16x128xf32>
    %cst_56 = arith.constant dense<0xFF800000> : vector<16xf32>
    %77 = vector.multi_reduction <maximumf>, %76, %cst_56 [1] : vector<16x128xf32> to vector<16xf32>
    %78 = vector.shape_cast %77 : vector<16xf32> to vector<16x1xf32>
    %79 = vector.broadcast %78 : vector<16x1xf32> to vector<16x128xf32>
    %80 = arith.subf %76, %79 : vector<16x128xf32>
    %81 = math.exp %80 : vector<16x128xf32>
    %cst_57 = arith.constant dense<0.000000e+00> : vector<16xf32>
    %82 = vector.multi_reduction <add>, %81, %cst_57 [1] : vector<16x128xf32> to vector<16xf32>
    %83 = vector.shape_cast %82 : vector<16xf32> to vector<16x1xf32>
    %84 = math.log %83 : vector<16x1xf32>
    %85 = vector.broadcast %84 : vector<16x1xf32> to vector<16x128xf32>
    %86 = arith.subf %80, %85 : vector<16x128xf32>
    %c0_58 = arith.constant 0 : index
    %c0_59 = arith.constant 0 : index
    %87 = vector.load %arg19[%c0_58, %c0_59] : memref<16x128xf32, #tpu.memory_space<vmem>>, vector<16x128xf32>
    tpu.vector_store %arg19[%c0_58, %c0_59], %86 {strides = array<i32>} : memref<16x128xf32, #tpu.memory_space<vmem>>, vector<16x128xf32>,
    return
  }
  func.func @transform_0(%arg0: i32) -> (i32, i32, i32) {
    %c0_i32 = arith.constant 0 : i32
    %c0_i32_0 = arith.constant 0 : i32
    %c0_i32_1 = arith.constant 0 : i32
    %c0_i32_2 = arith.constant 0 : i32
    return %c0_i32, %c0_i32_0, %c0_i32_1 : i32, i32, i32
  }
  func.func @transform_1(%arg0: i32) -> (i32, i32) {
    %c0_i32 = arith.constant 0 : i32
    %c0_i32_0 = arith.constant 0 : i32
    %c0_i32_1 = arith.constant 0 : i32
    return %c0_i32, %c0_i32_0 : i32, i32
  }
  func.func @transform_2(%arg0: i32) -> (i32, i32) {
    %c0_i32 = arith.constant 0 : i32
    %c0_i32_0 = arith.constant 0 : i32
    %c0_i32_1 = arith.constant 0 : i32
    return %c0_i32, %c0_i32_0 : i32, i32
  }
  func.func @transform_3(%arg0: i32) -> (i32, i32) {
    %c0_i32 = arith.constant 0 : i32
    %c0_i32_0 = arith.constant 0 : i32
    %c0_i32_1 = arith.constant 0 : i32
    return %c0_i32, %c0_i32_0 : i32, i32
  }
  func.func @transform_4(%arg0: i32) -> (i32, i32) {
    %c0_i32 = arith.constant 0 : i32
    %c0_i32_0 = arith.constant 0 : i32
    %c0_i32_1 = arith.constant 0 : i32
    return %c0_i32, %c0_i32_0 : i32, i32
  }
  func.func @transform_5(%arg0: i32) -> (i32, i32) {
    %c0_i32 = arith.constant 0 : i32
    %c0_i32_0 = arith.constant 0 : i32
    %c0_i32_1 = arith.constant 0 : i32
    return %c0_i32, %c0_i32_0 : i32, i32
  }
  func.func @transform_6(%arg0: i32) -> (i32, i32) {
    %c0_i32 = arith.constant 0 : i32
    %c0_i32_0 = arith.constant 0 : i32
    %c0_i32_1 = arith.constant 0 : i32
    return %c0_i32, %c0_i32_0 : i32, i32
  }
  func.func @transform_7(%arg0: i32) -> (i32, i32) {
    %c0_i32 = arith.constant 0 : i32
    %c0_i32_0 = arith.constant 0 : i32
    %c0_i32_1 = arith.constant 0 : i32
    return %c0_i32, %c0_i32_0 : i32, i32
  }
  func.func @transform_8(%arg0: i32) -> (i32, i32) {
    %c0_i32 = arith.constant 0 : i32
    %c0_i32_0 = arith.constant 0 : i32
    %c0_i32_1 = arith.constant 0 : i32
    return %c0_i32, %c0_i32_0 : i32, i32
  }
  func.func @transform_9(%arg0: i32) -> (i32, i32) {
    %c0_i32 = arith.constant 0 : i32
    %c0_i32_0 = arith.constant 0 : i32
    %c0_i32_1 = arith.constant 0 : i32
    return %c0_i32, %c0_i32_0 : i32, i32
  }
  func.func @transform_10(%arg0: i32) -> (i32, i32, i32) {
    %c0_i32 = arith.constant 0 : i32
    %c0_i32_0 = arith.constant 0 : i32
    %c0_i32_1 = arith.constant 0 : i32
    %c0_i32_2 = arith.constant 0 : i32
    return %c0_i32, %c0_i32_0, %c0_i32_1 : i32, i32, i32
  }
  func.func @transform_11(%arg0: i32) -> (i32, i32, i32) {
    %c0_i32 = arith.constant 0 : i32
    %c0_i32_0 = arith.constant 0 : i32
    %c0_i32_1 = arith.constant 0 : i32
    %c0_i32_2 = arith.constant 0 : i32
    return %c0_i32, %c0_i32_0, %c0_i32_1 : i32, i32, i32
  }
  func.func @transform_12(%arg0: i32) -> (i32, i32) {
    %c0_i32 = arith.constant 0 : i32
    %c0_i32_0 = arith.constant 0 : i32
    %c0_i32_1 = arith.constant 0 : i32
    return %c0_i32, %c0_i32_0 : i32, i32
  }
  func.func @transform_13(%arg0: i32) -> (i32, i32) {
    %c0_i32 = arith.constant 0 : i32
    %c0_i32_0 = arith.constant 0 : i32
    %c0_i32_1 = arith.constant 0 : i32
    return %c0_i32, %c0_i32_0 : i32, i32
  }
  func.func @transform_14(%arg0: i32) -> (i32, i32) {
    %c0_i32 = arith.constant 0 : i32
    %c0_i32_0 = arith.constant 0 : i32
    %c0_i32_1 = arith.constant 0 : i32
    return %c0_i32, %c0_i32_0 : i32, i32
  }
  func.func @transform_15(%arg0: i32) -> (i32, i32) {
    %c0_i32 = arith.constant 0 : i32
    %c0_i32_0 = arith.constant 0 : i32
    %c0_i32_1 = arith.constant 0 : i32
    return %c0_i32, %c0_i32_0 : i32, i32
  }
  func.func @transform_16(%arg0: i32) -> (i32, i32) {
    %c0_i32 = arith.constant 0 : i32
    %c0_i32_0 = arith.constant 0 : i32
    %c0_i32_1 = arith.constant 0 : i32
    return %c0_i32, %c0_i32_0 : i32, i32
  }
  func.func @transform_17(%arg0: i32) -> (i32, i32) {
    %c0_i32 = arith.constant 0 : i32
    %c0_i32_0 = arith.constant 0 : i32
    %c0_i32_1 = arith.constant 0 : i32
    return %c0_i32, %c0_i32_0 : i32, i32
  }
  func.func @transform_18(%arg0: i32) -> (i32, i32) {
    %c0_i32 = arith.constant 0 : i32
    %c0_i32_0 = arith.constant 0 : i32
    %c0_i32_1 = arith.constant 0 : i32
    return %c0_i32, %c0_i32_0 : i32, i32
  }
  func.func @transform_19(%arg0: i32) -> (i32, i32) {
    %c0_i32 = arith.constant 0 : i32
    %c0_i32_0 = arith.constant 0 : i32
    %c0_i32_1 = arith.constant 0 : i32
    return %c0_i32, %c0_i32_0 : i32, i32
  }
  func.func @transform_20(%arg0: i32) -> (i32, i32) {
    %c0_i32 = arith.constant 0 : i32
    %c0_i32_0 = arith.constant 0 : i32
    %c0_i32_1 = arith.constant 0 : i32
    return %c0_i32, %c0_i32_0 : i32, i32
  }
}

</mosaic_0001>

<bundles_post_ra>
// kernel: vae_forward.1
= control target key start
LH: loop header
LB: loop body
LE: loop exit
PB: predicated region body
PF: predicated region fallthrough
CT: control target
= control target key end

     0   :  { %s2645_s0 = inlined_call_operand.vmem [shape: f32[2,8,32], index: 0, kind: input, shape index: {}]   ;;  %s2646_s1 = inlined_call_operand.vmem [shape: f32[2,32], index: 1, kind: input, shape index: {}]   ;;  %s2647_s2 = inlined_call_operand.vmem [shape: f32[96,32], index: 2, kind: input, shape index: {}]   ;;  %s2648_s3 = inlined_call_operand.vmem [shape: f32[96,32], index: 3, kind: input, shape index: {}]   ;;  %s2649_s4 = inlined_call_operand.vmem [shape: f32[16,32], index: 4, kind: input, shape index: {}]   ;;  %s2650_s5 = inlined_call_operand.vmem [shape: f32[16,32], index: 5, kind: input, shape index: {}]   ;;  %s2651_s6 = inlined_call_operand.vmem [shape: f32[32,32], index: 6, kind: input, shape index: {}]   ;;  %s2652_s7 = inlined_call_operand.vmem [shape: f32[1,32], index: 7, kind: input, shape index: {}]   ;;  %s2653_s8 = inlined_call_operand.vmem [shape: f32[32,32], index: 8, kind: input, shape index: {}]   ;;  %s2654_s9 = inlined_call_operand.vmem [shape: f32[1,32], index: 9, kind: input, shape index: {}]   ;;  %s2655_s10 = inlined_call_operand.vmem [shape: f32[8,32,32], index: 10, kind: input, shape index: {}]   ;;  %s2656_s11 = inlined_call_operand.vmem [shape: f32[8,2,32], index: 11, kind: input, shape index: {}]   ;;  %s2657_s12 = inlined_call_operand.vmem [shape: f32[96,32], index: 12, kind: input, shape index: {}]   ;;  %s2658_s13 = inlined_call_operand.vmem [shape: f32[96,32], index: 13, kind: input, shape index: {}]   ;;  %s2659_s14 = inlined_call_operand.vmem [shape: f32[16,32], index: 14, kind: input, shape index: {}]   ;;  %s2660_s15 = inlined_call_operand.vmem [shape: f32[16,32], index: 15, kind: input, shape index: {}]   ;;  %s2661_s16 = inlined_call_operand.vmem [shape: f32[32,128], index: 16, kind: input, shape index: {}]   ;;  %s2662_s17 = inlined_call_operand.vmem [shape: f32[1,128], index: 17, kind: input, shape index: {}]   ;;  %s2663_s18 = inlined_call_operand.vmem [shape: f32[16,128], index: 18, kind: output, shape index: {0}]   ;;  %s2664_s19 = inlined_call_operand.hbm [shape: f32[2,32], index: 19, kind: output, shape index: {1}]   ;;  %s2665_s20 = inlined_call_operand.hbm [shape: f32[2,32], index: 20, kind: output, shape index: {2}]  }
   0x1   :  { %2670 = sst [smem:[#allocation8_spill]] %s2645_s0 }
   0x2   :  { %2671 = sst [smem:[#allocation9_spill]] %s2646_s1 }
   0x3   :  { %2672 = sst [smem:[#allocation10_spill]] %s2647_s2 }
   0x4   :  { %2673 = sst [smem:[#allocation11_spill]] %s2648_s3 }
   0x5   :  { %2674 = sst [smem:[#allocation12_spill]] %s2649_s4 }
   0x6   :  { %26 = vsyncpa [#allocation3], 0  ;;  %s2675_s23 = sld [smem:[#allocation8_spill]]  ;;  %vm79_vm0 = vcmask 1046528   ;;  %s2000_s27 = smov 32  }
   0x7   :  { %s2676_s26 = sld [smem:[#allocation10_spill]]  ;;  %s2001_s24 = smov 64  }
   0x8   :  { %s2677_s29 = sld [smem:[#allocation11_spill]] }
   0xc   :  { %v2115_v0 = vld [vmem:[%s2675_s23] sm:$0xff]  ;;  %v2120_v1 = vld [vmem:[%s2675_s23 + $0x8] sm:$0xff] }
   0xd   :  { %v113_v2 = vld [vmem:[%s2676_s26 + $0x58] sm:$0xff]  ;;  %82 = vrot.lane.b32.xlu0 %v2115_v0, %s2000_s27  ;;  %v75_v3 = vrot.slane %v2115_v0, 1  ;;  %v76_v4 = vrot.slane %v2120_v1, 1  ;;  %v112_v6 = vld [vmem:[%s2676_s26 + $0x50] sm:$0xff]  ;;  %v111_v9 = vld [vmem:[%s2676_s26 + $0x48] sm:$0xff] }
   0xe   :  { %1694 = vmatprep.subr.mxu0 %v113_v2  ;;  %v209_v5 = vld [vmem:[%s2677_s29 + $0x58] sm:$0xff]  ;;  %v208_v7 = vld [vmem:[%s2677_s29 + $0x50] sm:$0xff]  ;;  %v207_v10 = vld [vmem:[%s2677_s29 + $0x48] sm:$0xff] }
   0xf   :  { %1721 = vmatprep.subr.mxu1 %v209_v5  ;;  %1695 = vmatpush3.msra.mxu0 %v113_v2  ;;  %v80_v8 = vsel %vm79_vm0, %v75_v3, 0.0  ;;  %v81_v11 = vsel %vm79_vm0, %v76_v4, 0.0  ;;  %v110_v12 = vld [vmem:[%s2676_s26 + $0x40] sm:$0xff]  ;;  %v109_v14 = vld [vmem:[%s2676_s26 + $0x38] sm:$0xff] }
  0x10   :  { %1722 = vmatpush3.msra.mxu1 %v209_v5  ;;  %1696 = vmatprep.subr.mxu0 %v112_v6  ;;  %v206_v13 = vld [vmem:[%s2677_s29 + $0x40] sm:$0xff]  ;;  %v205_v15 = vld [vmem:[%s2677_s29 + $0x38] sm:$0xff] }
  0x11   :  { %90 = vrot.lane.b32.xlu1 %v80_v8, %s2001_s24  ;;  %1723 = vmatprep.subr.mxu1 %v208_v7 }
  0x12   :  { %84 = vrot.lane.b32.xlu0 %v2120_v1, %s2000_s27  ;;  %1697 = vmatpush3.msra.mxu0 %v112_v6 }
  0x13   :  { %1724 = vmatpush3.msra.mxu1 %v208_v7  ;;  %1698 = vmatprep.subr.mxu0 %v111_v9 }
  0x14   :  { %1725 = vmatprep.subr.mxu1 %v207_v10  ;;  %1699 = vmatpush3.msra.mxu0 %v111_v9 }
  0x15   :  { %92 = vrot.lane.b32.xlu1 %v81_v11, %s2001_s24  ;;  %1726 = vmatpush3.msra.mxu1 %v207_v10 }
  0x16   :  { %1700 = vmatprep.subr.mxu0 %v110_v12  ;;  %1727 = vmatprep.subr.mxu1 %v206_v13 }
  0x17   :  { %27 = vsyncpa [#allocation5], 0  ;;  %1701 = vmatpush3.msra.mxu0 %v110_v12  ;;  %1728 = vmatpush3.msra.mxu1 %v206_v13  ;;  %v108_v16 = vld [vmem:[%s2676_s26 + $0x30] sm:$0xff]  ;;  %v107_v18 = vld [vmem:[%s2676_s26 + $0x28] sm:$0xff]  ;;  %v68_v30 = vrot.slane %v2115_v0, 7  ;;  %vm72_vm1 = vcmask 1040384  }
  0x18   :  { %v204_v17 = vld [vmem:[%s2677_s29 + $0x30] sm:$0xff]  ;;  %1702 = vmatprep.subr.mxu0 %v109_v14  ;;  %1729 = vmatprep.subr.mxu1 %v205_v15  ;;  %v203_v19 = vld [vmem:[%s2677_s29 + $0x28] sm:$0xff]  ;;  %v106_v20 = vld [vmem:[%s2676_s26 + $0x20] sm:$0xff]  ;;  %v69_v31 = vrot.slane %v2120_v1, 7  ;;  %vm96_vm2 = vcmask 261120   ;;  %vm99_vm3 = vcmask 523264  }
  0x19   :  { %1703 = vmatpush3.msra.mxu0 %v109_v14  ;;  %1730 = vmatpush3.msra.mxu1 %v205_v15  ;;  %v202_v21 = vld [vmem:[%s2677_s29 + $0x20] sm:$0xff]  ;;  %v105_v22 = vld [vmem:[%s2676_s26 + $0x18] sm:$0xff]  ;;  %v104_v24 = vld [vmem:[%s2676_s26 + $0x10] sm:$0xff]  ;;  %v73_v32 = vsel %vm72_vm1, 0.0, %v68_v30  ;;  %vm116_vm4 = vcmask 785408   ;;  %v2002_v44 = vmov 0.0  }
  0x1a   :  { %1704 = vmatprep.subr.mxu0 %v108_v16  ;;  %1731 = vmatprep.subr.mxu1 %v204_v17  ;;  %v201_v23 = vld [vmem:[%s2677_s29 + $0x18] sm:$0xff]  ;;  %v200_v25 = vld [vmem:[%s2677_s29 + $0x10] sm:$0xff]  ;;  %v103_v26 = vld [vmem:[%s2676_s26 + $0x8] sm:$0xff]  ;;  %v74_v35 = vsel %vm72_vm1, 0.0, %v69_v31  ;;  %vm2003_vm5 = vmmov 0   ;;  %s2678_s23 = sld [smem:[#allocation12_spill]] }
  0x1b   :  { %1705 = vmatpush3.msra.mxu0 %v108_v16  ;;  %1732 = vmatpush3.msra.mxu1 %v204_v17  ;;  %v199_v27 = vld [vmem:[%s2677_s29 + $0x8] sm:$0xff]  ;;  %v102_v28 = vld [vmem:[%s2676_s26] sm:$0xff]  ;;  %v321_v42 = vld [vmem:[%s2651_s6 + $0x18] sm:$0xff]  ;;  %vm331_vm6 = vcmask 1041409   ;;  %vm486_vm7 = vcmask 254976   ;;  %s2679_s30 = sld [smem:[#allocation9_spill]] }
  0x1c   :  { %1706 = vmatprep.subr.mxu0 %v107_v18  ;;  %1733 = vmatprep.subr.mxu1 %v203_v19  ;;  %v198_v29 = vld [vmem:[%s2677_s29] sm:$0xff]  ;;  %v408_v43 = vld [vmem:[%s2653_s8 + $0x18] sm:$0xff]  ;;  %v320_v45 = vld [vmem:[%s2651_s6 + $0x10] sm:$0xff] }
  0x1d   :  { %1707 = vmatpush3.msra.mxu0 %v107_v18  ;;  %1734 = vmatpush3.msra.mxu1 %v203_v19  ;;  %v407_v46 = vld [vmem:[%s2653_s8 + $0x10] sm:$0xff]  ;;  %v319_v47 = vld [vmem:[%s2651_s6 + $0x8] sm:$0xff]  ;;  %v318_v49 = vld [vmem:[%s2651_s6] sm:$0xff] }
  0x1e   :  { %1708 = vmatprep.subr.mxu0 %v106_v20  ;;  %1735 = vmatprep.subr.mxu1 %v202_v21  ;;  %v406_v48 = vld [vmem:[%s2653_s8 + $0x8] sm:$0xff]  ;;  %v405_v50 = vld [vmem:[%s2653_s8] sm:$0xff] }
  0x1f   :  { %1709 = vmatpush3.msra.mxu0 %v106_v20  ;;  %1736 = vmatpush3.msra.mxu1 %v202_v21  ;;  %v211_v51 = vld [vmem:[%s2650_s5 + $0x8] sm:$0xff]  ;;  %v210_v53 = vld [vmem:[%s2650_s5] sm:$0xff] }
  0x20   :  { %1710 = vmatprep.subr.mxu0 %v105_v22  ;;  %1737 = vmatprep.subr.mxu1 %v201_v23  ;;  %v115_v0 = vld [vmem:[%s2678_s23 + $0x8] sm:$0xff]  ;;  %v114_v2 = vld [vmem:[%s2678_s23] sm:$0xff] }
  0x21   :  { %1711 = vmatpush3.msra.mxu0 %v105_v22  ;;  %1738 = vmatpush3.msra.mxu1 %v201_v23  ;;  %v496_v30 = vld [vmem:[%s2655_s10 + $0x8] sm:$0xff] }
  0x22   :  { %1712 = vmatprep.subr.mxu0 %v104_v24  ;;  %1739 = vmatprep.subr.mxu1 %v200_v25  ;;  %v500_v31 = vld [vmem:[%s2655_s10 + $0x28] sm:$0xff] }
  0x23   :  { %1713 = vmatpush3.msra.mxu0 %v104_v24  ;;  %1740 = vmatpush3.msra.mxu1 %v200_v25 }
  0x24   :  { %1714 = vmatprep.subr.mxu0 %v103_v26  ;;  %1741 = vmatprep.subr.mxu1 %v199_v27 }
  0x25   :  { %1715 = vmatpush3.msra.mxu0 %v103_v26  ;;  %1742 = vmatpush3.msra.mxu1 %v199_v27  ;;  %v498_v26 = vld [vmem:[%s2655_s10 + $0x18] sm:$0xff] }
  0x26   :  { %1716 = vmatprep.subr.mxu0 %v102_v28  ;;  %1743 = vmatprep.subr.mxu1 %v198_v29  ;;  %v502_v27 = vld [vmem:[%s2655_s10 + $0x38] sm:$0xff] }
  0x27   :  { %1717 = vmatpush3.msra.mxu0 %v102_v28  ;;  %1744 = vmatpush3.msra.mxu1 %v198_v29  ;;  %v497_v28 = vld [vmem:[%s2655_s10 + $0x10] sm:$0xff] }
  0x28   :  { %1748 = vmatprep.subr.mxu0 %v2002_v44  ;;  %1759 = vmatprep.subr.mxu1 %v2002_v44  ;;  %v501_v29 = vld [vmem:[%s2655_s10 + $0x30] sm:$0xff] }
  0x7f   :  { %v83_v33 = vpop.permute.xlu0 %82 }
  0x80   :  { %v97_v34 = vsel %vm96_vm2, %v73_v32, %v83_v33  ;;  %v495_v32 = vld [vmem:[%s2655_s10] sm:$0xff] }
  0x81   :  { %v499_v33 = vld [vmem:[%s2655_s10 + $0x20] sm:$0xff] }
  0x83   :  { %v91_v36 = vpop.permute.xlu1 %90 }
  0x84   :  { %v100_v37 = vsel %vm99_vm3, %v97_v34, %v91_v36  ;;  %v85_v38 = vpop.permute.xlu0 %84  ;;  %v1561_v34 = vld [vmem:[%s2652_s7] ss:$0 sm:$0xff] }
  0x85   :  { %1718 = vmatprep.mubr.msk.f32.mxu0 %vm116_vm4, %v100_v37  ;;  %1745 = vmatprep.mubr.msk.f32.mxu1 %vm116_vm4, %v100_v37  ;;  %v98_v39 = vsel %vm96_vm2, %v74_v35, %v85_v38  ;;  %v1563_v35 = vld [vmem:[%s2654_s9] ss:$0 sm:$0xff] }
  0x87   :  { %v93_v40 = vpop.permute.xlu1 %92 }
  0x88   :  { %v101_v41 = vsel %vm99_vm3, %v98_v39, %v93_v40 }
  0x89   :  { %1719 = vmatmul.mubr.msk.f32.vlgmr.msra.gmra.mxu0 %vm116_vm4, %v101_v41  ;;  %1746 = vmatmul.mubr.msk.f32.vlgmr.msra.gmra.mxu1 %vm116_vm4, %v101_v41 }
  0x8a   :  { %1749 = vmatpush3.msra.mxu0 %v321_v42  ;;  %1760 = vmatpush3.msra.mxu1 %v408_v43 }
  0x8b   :  { %1750 = vmatprep.subr.mxu0 %v2002_v44  ;;  %1761 = vmatprep.subr.mxu1 %v2002_v44 }
  0x8c   :  { %1751 = vmatpush3.msra.mxu0 %v320_v45  ;;  %1762 = vmatpush3.msra.mxu1 %v407_v46  ;;  %v489_v45 = vld [vmem:[%s2679_s30] sm:$0x3] }
  0x8d   :  { %1752 = vmatprep.subr.mxu0 %v2002_v44  ;;  %1763 = vmatprep.subr.mxu1 %v2002_v44 }
  0x8e   :  { %1753 = vmatpush3.msra.mxu0 %v319_v47  ;;  %1764 = vmatpush3.msra.mxu1 %v406_v48 }
  0x8f   :  { %1754 = vmatprep.subr.mxu0 %v2002_v44  ;;  %1765 = vmatprep.subr.mxu1 %v2002_v44 }
  0x90   :  { %1755 = vmatpush3.msra.mxu0 %v318_v49  ;;  %1756 = vmatprep.mubr.msk.f32.mxu0 %vm2003_vm5, %v2002_v44  ;;  %v506_v49 = vld [vmem:[%s2655_s10 + $0x58] sm:$0xff] }
  0x91   :  { %1766 = vmatpush3.msra.mxu1 %v405_v50  ;;  %1767 = vmatprep.mubr.msk.f32.mxu1 %vm2003_vm5, %v2002_v44  ;;  %v510_v50 = vld [vmem:[%s2655_s10 + $0x78] sm:$0xff] }
  0x92   :  { %1770 = vmatprep.subr.mxu0 %v2002_v44  ;;  %1781 = vmatprep.subr.mxu1 %v2002_v44 }
 0x149   :  { %v1747_v52 = vpop.f32.mrf.mxu1  ;;  %v1720_v63 = vpop.f32.mrf.mxu0 }
 0x14a   :  { %v284_v54 = vadd.f32 %v1747_v52, %v211_v51  ;;  %v195_v3 = vadd.f32 %v1720_v63, %v115_v0  ;;  %v505_v51 = vld [vmem:[%s2655_s10 + $0x50] sm:$0xff]  ;;  %v511_v63 = vld [vmem:[%s2655_s10 + $0x80] sm:$0xff] }
 0x14b   :  { %v278_v55 = vpop.f32.mrf.mxu1  ;;  %v189_v1 = vpop.f32.mrf.mxu0  ;;  %v509_v52 = vld [vmem:[%s2655_s10 + $0x70] sm:$0xff]  ;;  %v515_v0 = vld [vmem:[%s2655_s10 + $0xa0] sm:$0xff] }
 0x14c   :  { %v1560_v56 = vmul.f32 -1.442695, %v284_v54  ;;  %v279_v57 = vadd.f32 %v278_v55, %v210_v53  ;;  %v190_v5 = vadd.f32 %v189_v1, %v114_v2  ;;  %v504_v53 = vld [vmem:[%s2655_s10 + $0x48] sm:$0xff]  ;;  %v503_v55 = vld [vmem:[%s2655_s10 + $0x40] sm:$0xff]  ;;  %v522_v1 = vld [vmem:[%s2655_s10 + $0xd8] sm:$0xff] }
 0x14d   :  { %v508_v54 = vld [vmem:[%s2655_s10 + $0x68] sm:$0xff]  ;;  %v526_v2 = vld [vmem:[%s2655_s10 + $0xf8] sm:$0xff] }
 0x14e   :  { %1930 = vpow2.f32 %v1560_v56  ;;  %v1559_v58 = vmul.f32 -1.442695, %v279_v57  ;;  %v507_v56 = vld [vmem:[%s2655_s10 + $0x60] sm:$0xff]  ;;  %v514_v57 = vld [vmem:[%s2655_s10 + $0x98] sm:$0xff] }
 0x150   :  { %1932 = vpow2.f32 %v1559_v58  ;;  %v518_v58 = vld [vmem:[%s2655_s10 + $0xb8] sm:$0xff] }
 0x15b   :  { %v1931_v59 = vpop.eup %1930 }
 0x15c   :  { %v294_v60 = vadd.f32 1.0, %v1931_v59  ;;  %v513_v59 = vld [vmem:[%s2655_s10 + $0x90] sm:$0xff] }
 0x15d   :  { %v1933_v61 = vpop.eup %1932 }
 0x15e   :  { %1934 = vrcp.f32 %v294_v60  ;;  %v293_v62 = vadd.f32 1.0, %v1933_v61  ;;  %v517_v60 = vld [vmem:[%s2655_s10 + $0xb0] sm:$0xff]  ;;  %v512_v61 = vld [vmem:[%s2655_s10 + $0x88] sm:$0xff] }
 0x160   :  { %1936 = vrcp.f32 %v293_v62  ;;  %v516_v62 = vld [vmem:[%s2655_s10 + $0xa8] sm:$0xff] }
 0x16b   :  { %v1935_v4 = vpop.eup %1934 }
 0x16c   :  { %v300_v6 = vmul.f32 %v1935_v4, %v195_v3  ;;  %v521_v3 = vld [vmem:[%s2655_s10 + $0xd0] sm:$0xff] }
 0x16d   :  { %v1937_v7 = vpop.eup %1936  ;;  %v525_v4 = vld [vmem:[%s2655_s10 + $0xf0] sm:$0xff] }
 0x16e   :  { %v299_v8 = vmul.f32 %v1937_v7, %v190_v5  ;;  %v308_v9 = vsel %vm96_vm2, %v300_v6, 0.0  ;;  %v520_v5 = vld [vmem:[%s2655_s10 + $0xc8] sm:$0xff]  ;;  %v519_v7 = vld [vmem:[%s2655_s10 + $0xc0] sm:$0xff] }
 0x16f   :  { %v309_v10 = vrot.slane %v308_v9, 4  ;;  %v524_v6 = vld [vmem:[%s2655_s10 + $0xe8] sm:$0xff] }
 0x170   :  { %v301_v11 = vsel %vm96_vm2, %v299_v8, 0.0  ;;  %v523_v8 = vld [vmem:[%s2655_s10 + $0xe0] sm:$0xff] }
 0x171   :  { %v302_v12 = vrot.slane %v301_v11, 4  ;;  %v310_v13 = vadd.f32 %v309_v10, %v308_v9  ;;  %v527_v9 = vld [vmem:[%s2656_s11] sm:$0x3]  ;;  %v528_v10 = vld [vmem:[%s2656_s11 + $0x2] sm:$0x3] }
 0x173   :  { %v303_v14 = vadd.f32 %v302_v12, %v301_v11  ;;  %v311_v15 = vrot.slane %v310_v13, 2 }
 0x175   :  { %v304_v16 = vrot.slane %v303_v14, 2  ;;  %v312_v17 = vadd.f32 %v311_v15, %v310_v13 }
 0x177   :  { %v305_v18 = vadd.f32 %v304_v16, %v303_v14  ;;  %v313_v19 = vrot.slane %v312_v17, 1 }
 0x179   :  { %v306_v20 = vrot.slane %v305_v18, 1  ;;  %v314_v21 = vadd.f32 %v313_v19, %v312_v17  ;;  %v1182_v17 = vld [vmem:[%s2657_s12 + $0x58] sm:$0xff]  ;;  %v530_v19 = vld [vmem:[%s2656_s11 + $0x6] sm:$0x3] }
 0x17b   :  { %v307_v22 = vadd.f32 %v306_v20, %v305_v18  ;;  %v317_v24 = vmul.f32 0.125, %v314_v21  ;;  %v1317_v18 = vld [vmem:[%s2658_s13 + $0x58] sm:$0xff]  ;;  %v529_v20 = vld [vmem:[%s2656_s11 + $0x4] sm:$0x3] }
 0x17d   :  { %v316_v23 = vmul.f32 0.125, %v307_v22 }
 0x17f   :  { %v332_v25 = vsel %vm331_vm6, %v317_v24, %v316_v23  ;;  %v1181_v23 = vld [vmem:[%s2657_s12 + $0x50] sm:$0xff] }
 0x180   :  { %1757 = vmatmul.mubr.msk.f32.vlgmr.msra.gmra.mxu0 %vm96_vm2, %v332_v25  ;;  %1768 = vmatmul.mubr.msk.f32.vlgmr.msra.gmra.mxu1 %vm96_vm2, %v332_v25  ;;  %v1316_v24 = vld [vmem:[%s2658_s13 + $0x50] sm:$0xff] }
 0x181   :  { %1778 = vmatprep.mubr.msk.f32.mxu0 %vm2003_vm5, %v2002_v44  ;;  %1789 = vmatprep.mubr.msk.f32.mxu1 %vm2003_vm5, %v2002_v44 }
 0x182   :  { %1771 = vmatpush3.msra.mxu0 %v498_v26  ;;  %1782 = vmatpush3.msra.mxu1 %v502_v27  ;;  %v1180_v27 = vld [vmem:[%s2657_s12 + $0x48] sm:$0xff] }
 0x183   :  { %1772 = vmatprep.subr.mxu0 %v2002_v44  ;;  %1783 = vmatprep.subr.mxu1 %v2002_v44 }
 0x184   :  { %1773 = vmatpush3.msra.mxu0 %v497_v28  ;;  %1784 = vmatpush3.msra.mxu1 %v501_v29  ;;  %v1315_v28 = vld [vmem:[%s2658_s13 + $0x48] sm:$0xff] }
 0x185   :  { %1774 = vmatprep.subr.mxu0 %v2002_v44  ;;  %1785 = vmatprep.subr.mxu1 %v2002_v44 }
 0x186   :  { %1775 = vmatpush3.msra.mxu0 %v496_v30  ;;  %1786 = vmatpush3.msra.mxu1 %v500_v31  ;;  %v1179_v31 = vld [vmem:[%s2657_s12 + $0x40] sm:$0xff] }
 0x187   :  { %1776 = vmatprep.subr.mxu0 %v2002_v44  ;;  %1787 = vmatprep.subr.mxu1 %v2002_v44 }
 0x188   :  { %1777 = vmatpush3.msra.mxu0 %v495_v32  ;;  %1788 = vmatpush3.msra.mxu1 %v499_v33  ;;  %v1314_v32 = vld [vmem:[%s2658_s13 + $0x40] sm:$0xff]  ;;  %v532_v33 = vld [vmem:[%s2656_s11 + $0xa] sm:$0x3] }
 0x189   :  { %1792 = vmatprep.subr.mxu0 %v2002_v44  ;;  %1803 = vmatprep.subr.mxu1 %v2002_v44 }
 0x240   :  { %v401_v36 = vpop.f32.mrf.mxu0  ;;  %v482_v37 = vpop.f32.mrf.mxu1 }
 0x241   :  { %v402_v38 = vadd.f32 %v1561_v34, %v401_v36  ;;  %v483_v39 = vadd.f32 %v1563_v35, %v482_v37  ;;  %v531_v34 = vld [vmem:[%s2656_s11 + $0x8] sm:$0x3]  ;;  %v1178_v35 = vld [vmem:[%s2657_s12 + $0x38] sm:$0xff] }
 0x242   :  { %v1758_v40 = vpop.f32.mrf.mxu0  ;;  %v1769_v41 = vpop.f32.mrf.mxu1  ;;  %v1313_v36 = vld [vmem:[%s2658_s13 + $0x38] sm:$0xff] }
 0x243   :  { %v490_v42 = vmul.f32 0.5, %v483_v39  ;;  %487 = vst.msk [vmem:[#allocation2] sm:$0x3] %vm486_vm7, %v402_v38  ;;  %488 = vst.msk [vmem:[#allocation4] sm:$0x3] %vm486_vm7, %v483_v39  ;;  %v1177_v39 = vld [vmem:[%s2657_s12 + $0x30] sm:$0xff] }
 0x244   :  { %v1312_v40 = vld [vmem:[%s2658_s13 + $0x30] sm:$0xff] }
 0x245   :  { %v491_v43 = vmul.f32 1.442695, %v490_v42 }
 0x247   :  { %1938 = vpow2.f32 %v491_v43 }
 0x254   :  { %v1939_v46 = vpop.eup %1938 }
 0x255   :  { %v493_v47 = vmul.f32 %v1939_v46, %v489_v45  ;;  %v1176_v46 = vld [vmem:[%s2657_s12 + $0x28] sm:$0xff] }
 0x257   :  { %v2313_v48 = vadd.f32 %v493_v47, %v402_v38  ;;  %v1311_v47 = vld [vmem:[%s2658_s13 + $0x28] sm:$0xff] }
 0x259   :  { %1779 = vmatmul.mubr.msk.f32.vlgmr.msra.gmra.mxu0 %vm96_vm2, %v2313_v48  ;;  %1790 = vmatmul.mubr.msk.f32.vlgmr.msra.gmra.mxu1 %vm96_vm2, %v2313_v48 }
 0x25a   :  { %1793 = vmatpush3.msra.mxu0 %v506_v49  ;;  %1804 = vmatpush3.msra.mxu1 %v510_v50  ;;  %v1310_v49 = vld [vmem:[%s2658_s13 + $0x20] sm:$0xff]  ;;  %v1174_v50 = vld [vmem:[%s2657_s12 + $0x18] sm:$0xff] }
 0x25b   :  { %1794 = vmatprep.subr.mxu0 %v2002_v44  ;;  %1805 = vmatprep.subr.mxu1 %v2002_v44 }
 0x25c   :  { %1795 = vmatpush3.msra.mxu0 %v505_v51  ;;  %1806 = vmatpush3.msra.mxu1 %v509_v52  ;;  %v1309_v51 = vld [vmem:[%s2658_s13 + $0x18] sm:$0xff]  ;;  %v534_v52 = vld [vmem:[%s2656_s11 + $0xe] sm:$0x3] }
 0x25d   :  { %1796 = vmatprep.subr.mxu0 %v2002_v44  ;;  %1807 = vmatprep.subr.mxu1 %v2002_v44 }
 0x25e   :  { %1797 = vmatpush3.msra.mxu0 %v504_v53  ;;  %1808 = vmatpush3.msra.mxu1 %v508_v54  ;;  %v533_v53 = vld [vmem:[%s2656_s11 + $0xc] sm:$0x3]  ;;  %v1173_v54 = vld [vmem:[%s2657_s12 + $0x10] sm:$0xff]  ;;  %s2006_s11 = smov [#allocation4]  }
 0x25f   :  { %1798 = vmatprep.subr.mxu0 %v2002_v44  ;;  %1809 = vmatprep.subr.mxu1 %v2002_v44  ;;  %s1541_s25 = sshll.u32 %s2006_s11, 4  ;;  %s1542_s25 = int_to_ptr.vmem [resolvable:$true] %s1541_s25 }
 0x260   :  { %1799 = vmatpush3.msra.mxu0 %v503_v55  ;;  %1800 = vmatprep.mubr.msk.f32.mxu0 %vm2003_vm5, %v2002_v44  ;;  %v1308_v55 = vld [vmem:[%s2658_s13 + $0x10] sm:$0xff] }
 0x261   :  { %1810 = vmatpush3.msra.mxu1 %v507_v56  ;;  %1811 = vmatprep.mubr.msk.f32.mxu1 %vm2003_vm5, %v2002_v44 }
 0x262   :  { %1801 = vmatmul.mubr.msk.f32.vlgmr.msra.gmra.mxu0 %vm96_vm2, %v2313_v48  ;;  %1812 = vmatmul.mubr.msk.f32.vlgmr.msra.gmra.mxu1 %vm96_vm2, %v2313_v48 }
 0x263   :  { %1814 = vmatprep.subr.mxu0 %v2002_v44  ;;  %1825 = vmatprep.subr.mxu1 %v2002_v44 }
 0x264   :  { %1815 = vmatpush3.msra.mxu0 %v514_v57  ;;  %1826 = vmatpush3.msra.mxu1 %v518_v58 }
 0x265   :  { %1816 = vmatprep.subr.mxu0 %v2002_v44  ;;  %1827 = vmatprep.subr.mxu1 %v2002_v44 }
 0x266   :  { %1817 = vmatpush3.msra.mxu0 %v513_v59  ;;  %1828 = vmatpush3.msra.mxu1 %v517_v60 }
 0x267   :  { %1818 = vmatprep.subr.mxu0 %v2002_v44  ;;  %1829 = vmatprep.subr.mxu1 %v2002_v44 }
 0x268   :  { %1819 = vmatpush3.msra.mxu0 %v512_v61  ;;  %1830 = vmatpush3.msra.mxu1 %v516_v62  ;;  %v1172_v62 = vld [vmem:[%s2657_s12 + $0x8] sm:$0xff] }
 0x269   :  { %1820 = vmatprep.subr.mxu0 %v2002_v44  ;;  %1831 = vmatprep.subr.mxu1 %v2002_v44 }
 0x26a   :  { %1821 = vmatpush3.msra.mxu0 %v511_v63  ;;  %1822 = vmatprep.mubr.msk.f32.mxu0 %vm2003_vm5, %v2002_v44  ;;  %v1307_v63 = vld [vmem:[%s2658_s13 + $0x8] sm:$0xff] }
 0x26b   :  { %1832 = vmatpush3.msra.mxu1 %v515_v0  ;;  %1833 = vmatprep.mubr.msk.f32.mxu1 %vm2003_vm5, %v2002_v44  ;;  %v1171_v0 = vld [vmem:[%s2657_s12] sm:$0xff] }
 0x26c   :  { %1823 = vmatmul.mubr.msk.f32.vlgmr.msra.gmra.mxu0 %vm96_vm2, %v2313_v48  ;;  %1834 = vmatmul.mubr.msk.f32.vlgmr.msra.gmra.mxu1 %vm96_vm2, %v2313_v48 }
 0x26d   :  { %1836 = vmatprep.subr.mxu0 %v2002_v44  ;;  %1847 = vmatprep.subr.mxu1 %v2002_v44 }
 0x26e   :  { %1837 = vmatpush3.msra.mxu0 %v522_v1  ;;  %1848 = vmatpush3.msra.mxu1 %v526_v2  ;;  %v1306_v1 = vld [vmem:[%s2658_s13] sm:$0xff] }
 0x26f   :  { %1838 = vmatprep.subr.mxu0 %v2002_v44  ;;  %1849 = vmatprep.subr.mxu1 %v2002_v44 }
 0x270   :  { %1839 = vmatpush3.msra.mxu0 %v521_v3  ;;  %1850 = vmatpush3.msra.mxu1 %v525_v4 }
 0x271   :  { %1840 = vmatprep.subr.mxu0 %v2002_v44  ;;  %1851 = vmatprep.subr.mxu1 %v2002_v44 }
 0x272   :  { %1841 = vmatpush3.msra.mxu0 %v520_v5  ;;  %1852 = vmatpush3.msra.mxu1 %v524_v6 }
 0x273   :  { %1842 = vmatprep.subr.mxu0 %v2002_v44  ;;  %1853 = vmatprep.subr.mxu1 %v2002_v44 }
 0x274   :  { %1843 = vmatpush3.msra.mxu0 %v519_v7  ;;  %1844 = vmatprep.mubr.msk.f32.mxu0 %vm2003_vm5, %v2002_v44 }
 0x275   :  { %1854 = vmatpush3.msra.mxu1 %v523_v8  ;;  %1855 = vmatprep.mubr.msk.f32.mxu1 %vm2003_vm5, %v2002_v44 }
 0x276   :  { %1845 = vmatmul.mubr.msk.f32.vlgmr.msra.gmra.mxu0 %vm96_vm2, %v2313_v48  ;;  %1856 = vmatmul.mubr.msk.f32.vlgmr.msra.gmra.mxu1 %vm96_vm2, %v2313_v48  ;;  %v1175_v48 = vld [vmem:[%s2657_s12 + $0x20] sm:$0xff] }
 0x277   :  { %1858 = vmatprep.subr.mxu0 %v1182_v17  ;;  %1885 = vmatprep.subr.mxu1 %v1317_v18 }
 0x278   :  { %1859 = vmatpush3.msra.mxu0 %v1182_v17  ;;  %1886 = vmatpush3.msra.mxu1 %v1317_v18 }
 0x279   :  { %1860 = vmatprep.subr.mxu0 %v1181_v23  ;;  %1887 = vmatprep.subr.mxu1 %v1316_v24 }
 0x27a   :  { %1861 = vmatpush3.msra.mxu0 %v1181_v23  ;;  %1888 = vmatpush3.msra.mxu1 %v1316_v24 }
 0x27b   :  { %1862 = vmatprep.subr.mxu0 %v1180_v27  ;;  %1889 = vmatprep.subr.mxu1 %v1315_v28 }
 0x27c   :  { %1863 = vmatpush3.msra.mxu0 %v1180_v27  ;;  %1890 = vmatpush3.msra.mxu1 %v1315_v28 }
 0x27d   :  { %1864 = vmatprep.subr.mxu0 %v1179_v31  ;;  %1891 = vmatprep.subr.mxu1 %v1314_v32 }
 0x27e   :  { %1865 = vmatpush3.msra.mxu0 %v1179_v31  ;;  %1892 = vmatpush3.msra.mxu1 %v1314_v32 }
 0x27f   :  { %1866 = vmatprep.subr.mxu0 %v1178_v35  ;;  %1893 = vmatprep.subr.mxu1 %v1313_v36 }
 0x280   :  { %1867 = vmatpush3.msra.mxu0 %v1178_v35  ;;  %1894 = vmatpush3.msra.mxu1 %v1313_v36 }
 0x281   :  { %1868 = vmatprep.subr.mxu0 %v1177_v39  ;;  %1895 = vmatprep.subr.mxu1 %v1312_v40 }
 0x282   :  { %1869 = vmatpush3.msra.mxu0 %v1177_v39  ;;  %1896 = vmatpush3.msra.mxu1 %v1312_v40 }
 0x283   :  { %1870 = vmatprep.subr.mxu0 %v1176_v46  ;;  %1897 = vmatprep.subr.mxu1 %v1311_v47 }
 0x284   :  { %1871 = vmatpush3.msra.mxu0 %v1176_v46  ;;  %1898 = vmatpush3.msra.mxu1 %v1311_v47 }
 0x285   :  { %1872 = vmatprep.subr.mxu0 %v1175_v48  ;;  %1899 = vmatprep.subr.mxu1 %v1310_v49 }
 0x286   :  { %1873 = vmatpush3.msra.mxu0 %v1175_v48  ;;  %1900 = vmatpush3.msra.mxu1 %v1310_v49 }
 0x287   :  { %1874 = vmatprep.subr.mxu0 %v1174_v50  ;;  %1901 = vmatprep.subr.mxu1 %v1309_v51 }
 0x288   :  { %1875 = vmatpush3.msra.mxu0 %v1174_v50  ;;  %1902 = vmatpush3.msra.mxu1 %v1309_v51 }
 0x289   :  { %1876 = vmatprep.subr.mxu0 %v1173_v54  ;;  %1903 = vmatprep.subr.mxu1 %v1308_v55 }
 0x28a   :  { %1877 = vmatpush3.msra.mxu0 %v1173_v54  ;;  %1904 = vmatpush3.msra.mxu1 %v1308_v55  ;;  %v1319_v54 = vld [vmem:[%s2660_s15 + $0x8] sm:$0xff] }
 0x28b   :  { %1878 = vmatprep.subr.mxu0 %v1172_v62  ;;  %1905 = vmatprep.subr.mxu1 %v1307_v63 }
 0x28c   :  { %1879 = vmatpush3.msra.mxu0 %v1172_v62  ;;  %1906 = vmatpush3.msra.mxu1 %v1307_v63 }
 0x28d   :  { %1880 = vmatprep.subr.mxu0 %v1171_v0  ;;  %1907 = vmatprep.subr.mxu1 %v1306_v1 }
 0x28e   :  { %1881 = vmatpush3.msra.mxu0 %v1171_v0  ;;  %1908 = vmatpush3.msra.mxu1 %v1306_v1 }
 0x319   :  { %v604_v11 = vpop.f32.mrf.mxu0  ;;  %v674_v12 = vpop.f32.mrf.mxu1 }
 0x31a   :  { %v2443_v13 = vadd.f32 %v604_v11, %v527_v9  ;;  %v2445_v14 = vadd.f32 %v674_v12, %v528_v10  ;;  %v2004_v9 = vmov 1983009808   ;;  %v1198_v11 = vlaneseq }
 0x31b   :  { %v1780_v15 = vpop.f32.mrf.mxu0  ;;  %v1791_v16 = vpop.f32.mrf.mxu1  ;;  %v1196_v10 = vunpack.c.l.s4 %v2004_v9 }
 0x31c   :  { %1108 = vrot.lane.b32.xlu1 %v2445_v14, %s2000_s27  ;;  %1106 = vrot.lane.b32.xlu0 %v2443_v13, %s2000_s27  ;;  %v1199_v16 = vshrl.u32 %v1198_v11, 7 }
 0x31d   :  { %v1197_v15 = vunpack.c.0.s8 %v1196_v10 }
 0x31f   :  { %v1200_v23 = vsub.s32 %v1197_v15, %v1199_v16 }
 0x320   :  { %1131 = vrot.lane.b32.xlu0 %v2445_v14, %s2001_s24 }
 0x322   :  { %v814_v21 = vpop.f32.mrf.mxu1  ;;  %v744_v22 = vpop.f32.mrf.mxu0 }
 0x323   :  { %v2471_v25 = vadd.f32 %v814_v21, %v530_v19  ;;  %v2473_v26 = vadd.f32 %v744_v22, %v529_v20 }
 0x324   :  { %v1802_v29 = vpop.f32.mrf.mxu0  ;;  %v1813_v30 = vpop.f32.mrf.mxu1 }
 0x325   :  { %1112 = vrot.lane.b32.xlu1 %v2471_v25, %s2000_s27  ;;  %1110 = vrot.lane.b32.xlu0 %v2473_v26, %s2000_s27 }
 0x329   :  { %1133 = vrot.lane.b32.xlu1 %v2473_v26, %s2001_s24  ;;  %1135 = vrot.lane.b32.xlu0 %v2471_v25, %s2001_s24 }
 0x32c   :  { %v954_v37 = vpop.f32.mrf.mxu1  ;;  %v884_v38 = vpop.f32.mrf.mxu0 }
 0x32d   :  { %v2513_v41 = vadd.f32 %v954_v37, %v532_v33  ;;  %v2515_v42 = vadd.f32 %v884_v38, %v531_v34 }
 0x32e   :  { %v1824_v43 = vpop.f32.mrf.mxu0  ;;  %v1835_v45 = vpop.f32.mrf.mxu1 }
 0x32f   :  { %1116 = vrot.lane.b32.xlu1 %v2513_v41, %s2000_s27  ;;  %1114 = vrot.lane.b32.xlu0 %v2515_v42, %s2000_s27 }
 0x333   :  { %1137 = vrot.lane.b32.xlu1 %v2515_v42, %s2001_s24  ;;  %1139 = vrot.lane.b32.xlu0 %v2513_v41, %s2001_s24 }
 0x336   :  { %v1094_v56 = vpop.f32.mrf.mxu1  ;;  %v1024_v57 = vpop.f32.mrf.mxu0 }
 0x337   :  { %v1095_v58 = vadd.f32 %v1094_v56, %v534_v52  ;;  %v2555_v59 = vadd.f32 %v1024_v57, %v533_v53  ;;  %v1410_v52 = vld [vmem:[%s2661_s16 + $0x8] sm:$0xff]  ;;  %v1409_v53 = vld [vmem:[%s2661_s16] sm:$0xff] }
 0x338   :  { %v1846_v60 = vpop.f32.mrf.mxu0  ;;  %v1857_v61 = vpop.f32.mrf.mxu1  ;;  %v1318_v56 = vld [vmem:[%s2660_s15] sm:$0xff] }
 0x339   :  { %1120 = vrot.lane.b32.xlu1 %v1095_v58, %s2000_s27  ;;  %1118 = vrot.lane.b32.xlu0 %v2555_v59, %s2000_s27 }
 0x33d   :  { %1141 = vrot.lane.b32.xlu1 %v2555_v59, %s2001_s24  ;;  %1143 = vrot.lane.b32.xlu0 %v1095_v58, %s2001_s24 }
 0x341   :  { %1145 = vrot.lane.b32.xlu1 %v2002_v44, %s2001_s24 }
 0x38e   :  { %v1107_v2 = vpop.permute.xlu0 %1106  ;;  %v1109_v4 = vpop.permute.xlu1 %1108 }
 0x38f   :  { %v1156_v12 = vsel %vm96_vm2, %v2443_v13, %v1109_v4  ;;  %v1155_v44 = vsel %vm96_vm2, 0.0, %v1107_v2  ;;  %v1183_v4 = vld [vmem:[%s2659_s14] sm:$0xff] }
 0x392   :  { %v1132_v3 = vpop.permute.xlu0 %1131 }
 0x393   :  { %v1163_v20 = vsel %vm99_vm3, %v1155_v44, %v1132_v3 }
 0x397   :  { %v1113_v5 = vpop.permute.xlu1 %1112  ;;  %v1111_v6 = vpop.permute.xlu0 %1110 }
 0x398   :  { %v1158_v21 = vsel %vm96_vm2, %v2473_v26, %v1113_v5  ;;  %v1157_v22 = vsel %vm96_vm2, %v2445_v14, %v1111_v6  ;;  %v1184_v5 = vld [vmem:[%s2659_s14 + $0x8] sm:$0xff]  ;;  %s2005_s14 = smov [#allocation2]  }
 0x39b   :  { %v1134_v7 = vpop.permute.xlu1 %1133  ;;  %v1136_v8 = vpop.permute.xlu0 %1135 }
 0x39c   :  { %v1164_v19 = vsel %vm99_vm3, %v1156_v12, %v1134_v7  ;;  %v1165_v28 = vsel %vm99_vm3, %v1157_v22, %v1136_v8  ;;  %v1579_v12 = vld [vmem:[%s2662_s17] ss:$0 sm:$0xff]  ;;  %s1531_s17 = sshll.u32 %s2005_s14, 4  ;;  %s1532_s17 = int_to_ptr.vmem [resolvable:$true] %s1531_s17 }
 0x39d   :  { %v1193_v24 = vcombine.low %v1163_v20, %v1164_v19  ;;  %s1956_s3 = scalar_lea.vmem %s1532_s17, 32  ;;  %p1961_p1 = scmp.lt.s32.totalorder %s1532_s17, %s1532_s17 }
 0x39e   :  { %p1957_p0 = scmp.ne.s32.totalorder %s1532_s17, %s1956_s3  ;;  %p1962_p2 = scmp.lt.s32.totalorder %s1956_s3, %s1956_s3 }
 0x39f   :  { %v1201_v31 = vrot.slane %v1193_v24, %v1200_v23 }
 0x3a0   :  { %p1963_p3 = por %p1962_p2, %p1961_p1 }
 0x3a1   :  { %v1117_v17 = vpop.permute.xlu1 %1116  ;;  %v1115_v18 = vpop.permute.xlu0 %1114 }
 0x3a2   :  { %v1160_v14 = vsel %vm96_vm2, %v2515_v42, %v1117_v17  ;;  %v1159_v37 = vsel %vm96_vm2, %v2471_v25, %v1115_v18  ;;  %v1412_v25 = vld [vmem:[%s2661_s16 + $0x18] sm:$0xff]  ;;  %p1964_p4 = pnand %p1963_p3, %p1957_p0 }
 0x3a3   :  { %1912 = vmatprep.subr.mxu0 %v1412_v25 }
 0x3a5   :  { %v1138_v27 = vpop.permute.xlu1 %1137  ;;  %v1140_v13 = vpop.permute.xlu0 %1139 }
 0x3a6   :  { %v1166_v29 = vsel %vm99_vm3, %v1158_v21, %v1138_v27  ;;  %v1167_v39 = vsel %vm99_vm3, %v1159_v37, %v1140_v13 }
 0x3a7   :  { %v1194_v30 = vcombine.low %v1165_v28, %v1166_v29 }
 0x3a9   :  { %v1208_v32 = vrot.slane %v1194_v30, %v1200_v23 }
 0x3ab   :  { %v1209_v33 = vcombine.low %v1201_v31, %v1208_v32  ;;  %v1121_v34 = vpop.permute.xlu1 %1120  ;;  %v1119_v35 = vpop.permute.xlu0 %1118 }
 0x3ac   :  { %v1162_v40 = vsel %vm96_vm2, %v2555_v59, %v1121_v34  ;;  %v1161_v43 = vsel %vm96_vm2, %v2513_v41, %v1119_v35  ;;  %v1411_v41 = vld [vmem:[%s2661_s16 + $0x10] sm:$0xff] }
 0x3ad   :  { %1882 = vmatprep.mubr.msk.f32.mxu0 %vm116_vm4, %v1209_v33  ;;  %1909 = vmatprep.mubr.msk.f32.mxu1 %vm116_vm4, %v1209_v33 }
 0x3af   :  { %v1142_v26 = vpop.permute.xlu1 %1141  ;;  %v1144_v38 = vpop.permute.xlu0 %1143 }
 0x3b0   :  { %v1168_v36 = vsel %vm99_vm3, %v1160_v14, %v1142_v26  ;;  %v1169_v47 = vsel %vm99_vm3, %v1161_v43, %v1144_v38 }
 0x3b1   :  { %v1210_v45 = vcombine.low %v1167_v39, %v1168_v36 }
 0x3b3   :  { %v1146_v46 = vpop.permute.xlu1 %1145  ;;  %v1218_v49 = vrot.slane %v1210_v45, %v1200_v23 }
 0x3b4   :  { %v1170_v42 = vsel %vm99_vm3, %v1162_v40, %v1146_v46 }
 0x3b5   :  { %v1211_v48 = vcombine.low %v1169_v47, %v1170_v42 }
 0x3b7   :  { %v1225_v50 = vrot.slane %v1211_v48, %v1200_v23 }
 0x3b9   :  { %v1226_v51 = vcombine.low %v1218_v49, %v1225_v50 }
 0x3bb   :  { %1883 = vmatmul.mubr.msk.f32.vlgmr.msra.gmra.mxu0 %vm116_vm4, %v1226_v51  ;;  %1910 = vmatmul.mubr.msk.f32.vlgmr.msra.gmra.mxu1 %vm116_vm4, %v1226_v51 }
 0x3bc   :  { %1913 = vmatpush3.msra.mxu0 %v1412_v25 }
 0x3bd   :  { %1914 = vmatprep.subr.mxu0 %v1411_v41 }
 0x3be   :  { %1915 = vmatpush3.msra.mxu0 %v1411_v41 }
 0x3bf   :  { %1916 = vmatprep.subr.mxu0 %v1410_v52 }
 0x3c0   :  { %1917 = vmatpush3.msra.mxu0 %v1410_v52 }
 0x3c1   :  { %1918 = vmatprep.subr.mxu0 %v1409_v53 }
 0x3c2   :  { %1919 = vmatpush3.msra.mxu0 %v1409_v53 }
 0x47b   :  { %v1911_v55 = vpop.f32.mrf.mxu1  ;;  %v1884_v2 = vpop.f32.mrf.mxu0 }
 0x47c   :  { %v1392_v57 = vadd.f32 %v1911_v55, %v1319_v54  ;;  %v1303_v9 = vadd.f32 %v1884_v2, %v1184_v5 }
 0x47d   :  { %v1386_v58 = vpop.f32.mrf.mxu1  ;;  %v1297_v3 = vpop.f32.mrf.mxu0 }
 0x47e   :  { %v1578_v59 = vmul.f32 -1.442695, %v1392_v57  ;;  %v1387_v60 = vadd.f32 %v1386_v58, %v1318_v56  ;;  %v1298_v7 = vadd.f32 %v1297_v3, %v1183_v4 }
 0x480   :  { %1940 = vpow2.f32 %v1578_v59  ;;  %v1577_v61 = vmul.f32 -1.442695, %v1387_v60 }
 0x482   :  { %1942 = vpow2.f32 %v1577_v61 }
 0x48d   :  { %v1941_v62 = vpop.eup %1940 }
 0x48e   :  { %v1402_v63 = vadd.f32 1.0, %v1941_v62 }
 0x48f   :  { %v1943_v0 = vpop.eup %1942 }
 0x490   :  { %v1401_v1 = vadd.f32 1.0, %v1943_v0  ;;  %1944 = vrcp.f32 %v1402_v63 }
 0x492   :  { %1946 = vrcp.f32 %v1401_v1 }
 0x49d   :  { %v1945_v6 = vpop.eup %1944 }
 0x49e   :  { %v1408_v11 = vmul.f32 %v1945_v6, %v1303_v9 }
 0x49f   :  { %v1947_v8 = vpop.eup %1946 }
 0x4a0   :  { %v1407_v10 = vmul.f32 %v1947_v8, %v1298_v7 }
 0x4a2   :  { %1920 = vmatprep.mubr.msk.f32.mxu0 %vm96_vm2, %v1407_v10 }
 0x4a3   :  { %1921 = vmatmul.mubr.msk.f32.vlgmr.msra.gmra.mxu0 %vm96_vm2, %v1408_v11 }
 0x563   :  { %v1922_v15 = vpop.f32.mrf.mxu0 }
 0x564   :  { %v1498_v16 = vadd.f32 %v1922_v15, %v1579_v12 }
 0x565   :  { %v1492_v17 = vpop.f32.mrf.mxu0 }
 0x566   :  { %v1493_v18 = vadd.f32 %v1579_v12, %v1492_v17  ;;  %1503 = vmax.xlane.f32.xlu1 %v1498_v16 }
 0x568   :  { %1501 = vmax.xlane.f32.xlu0 %v1493_v18 }
 0x5ef   :  { %v1504_v19 = vpop.xlane.xlu1 %1503 }
 0x5f0   :  { %v1506_v20 = vsub.f32 %v1498_v16, %v1504_v19 }
 0x5f1   :  { %v1502_v44 = vpop.xlane.xlu0 %1501 }
 0x5f2   :  { %v1505_v21 = vsub.f32 %v1493_v18, %v1502_v44  ;;  %v1509_v23 = vmul.f32 1.442695, %v1506_v20 }
 0x5f4   :  { %v1507_v22 = vmul.f32 1.442695, %v1505_v21 }
 0x5f6   :  { %1948 = vpow2.f32 %v1507_v22 }
 0x5f7   :  { %1950 = vpow2.f32 %v1509_v23 }
 0x603   :  { %v1949_v24 = vpop.eup %1948 }
 0x604   :  { %1511 = vadd.xlane.f32.xlu0 %v1949_v24  ;;  %v1951_v27 = vpop.eup %1950 }
 0x608   :  { %1513 = vadd.xlane.f32.xlu0 %v1951_v27 }
 0x609   :  { %1967 = shalt.err (!%p1964_p4)
}
 0x60a   :  { %1534 = dma.vmem_to_hbm [thread:$0]  %s1532_s17, 32, %s2664_s19, [#allocation3]  }
 0x60b   :  { %s1976_s4 = scalar_lea.vmem %s1542_s25, 32  ;;  %p1981_p6 = scmp.lt.s32.totalorder %s1542_s25, %s1542_s25 }
 0x60c   :  { %p1977_p5 = scmp.ne.s32.totalorder %s1542_s25, %s1976_s4  ;;  %p1982_p7 = scmp.lt.s32.totalorder %s1976_s4, %s1976_s4 }
 0x60e   :  { %p1983_p8 = por %p1982_p7, %p1981_p6 }
 0x610   :  { %p1984_p9 = pnand %p1983_p8, %p1977_p5 }
 0x612   :  { %1987 = shalt.err (!%p1984_p9)
}
 0x613   :  { %1544 = dma.vmem_to_hbm [thread:$0]  %s1542_s25, 32, %s2665_s20, [#allocation5]  }
 0x68d   :  { %v1512_v13 = vpop.xlane.xlu0 %1511 }
 0x68e   :  { %1952 = vlog2.f32 %v1512_v13 }
 0x691   :  { %v1514_v28 = vpop.xlane.xlu0 %1513 }
 0x692   :  { %1954 = vlog2.f32 %v1514_v28 }
 0x69b   :  { %v1953_v29 = vpop.eup %1952 }
 0x69c   :  { %v1516_v30 = vmul.f32 0.6931472, %v1953_v29 }
 0x69e   :  { %v1519_v31 = vsub.f32 %v1505_v21, %v1516_v30 }
 0x69f   :  { %v1955_v32 = vpop.eup %1954 }
 0x6a0   :  { %1521 = vst [vmem:[%s2663_s18] sm:$0xff] %v1519_v31  ;;  %v1518_v33 = vmul.f32 0.6931472, %v1955_v32 }
 0x6a2   :  { %v1520_v34 = vsub.f32 %v1506_v20, %v1518_v33 }
 0x6a4   :  { %1522 = vst [vmem:[%s2663_s18 + $0x8] sm:$0xff] %v1520_v34 }
 0x6a5   :  { %1996 = dma.done.wait [#allocation3], 32  }
 0x6a6   :  { %1997 = vsyncadd [#allocation3], 4294967264 }
 0x6a7   :  { %1998 = dma.done.wait [#allocation5], 32  }
 0x6a8   :  { %1999 = vsyncadd [#allocation5], 4294967264 }
 0x6a9   :  { %1553 = vsyncpa [#allocation3], 1 }
 0x6aa   :  { %1554 = vsyncpa [#allocation5], 1 }

</bundles_post_ra>
